<compile_context>
chip_gen: v7x
topology: tpu7x:2x2x1
jax: 0.10.0
libtpu: 0.0.40
codegen_flags: <defaults>
</compile_context>

<pallas_src>
import jax
import jax.numpy as jnp
from jax.experimental import pallas as pl
from jax.experimental.pallas import tpu as pltpu

_LANES = 128
_ACC_ROWS = 32  # 4 independent (8,128) accumulation chains


def _round_up(a: int, b: int) -> int:
    return ((a + b - 1) // b) * b


def _cdiv(a: int, b: int) -> int:
    return -(-a // b)


def _elbo_ref(x, target, kl, beta, train_size):
    """Plain-jnp reference (also used as the tiny-input fallback)."""
    xf = x.astype(jnp.float32)
    tf = target.astype(jnp.float32)
    return (jnp.mean((xf - tf) ** 2)
            + jnp.asarray(beta, jnp.float32) * jnp.asarray(kl, jnp.float32)
            ) * jnp.float32(train_size)


def elbo_forward(x, target, kl, beta, train_size, *, tile_rows=None,
                 min_kernel_bytes=128 * 1024):
    """Pallas implementation of ELBO.forward(input, target, kl, beta)."""
    assert x.shape == target.shape
    n_elems = int(x.size)
    itemsize = int(jnp.dtype(x.dtype).itemsize)

    # Tiny inputs: a fused XLA reduction beats kernel-launch + grid overhead.
    if 2 * n_elems * itemsize < min_kernel_bytes:
        return _elbo_ref(x, target, kl, beta, train_size)

    # ---- tiling ------------------------------------------------------------
    if tile_rows is None:
        tile_rows = 4096 * 4 // max(1, itemsize)   # ~2 MiB per input block
    tile_rows = max(int(tile_rows), 512)           # floor: amortize ~0.35us/step
    rows_raw = _cdiv(n_elems, _LANES)              # rows of real data
    tr = _round_up(tile_rows, _ACC_ROWS)
    # Cap per-block bytes at 4 MiB so 2 inputs x 2 pipeline buffers stay well
    # inside v5e's scoped-VMEM budget (limit also raised explicitly below).
    max_tr = max(_ACC_ROWS,
                 (4 * 1024 * 1024 // (_LANES * itemsize)) // _ACC_ROWS * _ACC_ROWS)
    tr = min(tr, max_tr)
    tr = min(tr, _round_up(rows_raw, _ACC_ROWS))   # never bigger than needed

    # ---- layout: lane-dense (rows, 128) view, minimal padding ---------------
    arr_rows = max(rows_raw, tr)                   # >= one full tile
    padded = arr_rows * _LANES
    xf = x.reshape(-1)
    tf = target.reshape(-1)
    if padded != n_elems:
        # Only when n % 128 != 0 (pads < 128 elems to complete the last row)
        # or when the whole array is smaller than one tile (cheap copy).
        # Large, 128-aligned inputs take the zero-copy path.
        xf = jnp.pad(xf, (0, padded - n_elems))
        tf = jnp.pad(tf, (0, padded - n_elems))
    x2 = xf.reshape(arr_rows, _LANES)              # native dtype, no upcast
    t2 = tf.reshape(arr_rows, _LANES)

    n_tiles = _cdiv(arr_rows, tr)
    num_chunks = 2 if n_tiles >= 2 else 1          # one chunk per TC on v7x
    tpc = _cdiv(n_tiles, num_chunks)               # tiles per chunk (ceil)

    def in_map(c, i):
        # Odd tile counts: chunk 1's last step would run past the array.
        # Clamp to the last real tile; the in-kernel row mask zeroes it out.
        return (jnp.minimum(c * tpc + i, n_tiles - 1), 0)

    def kernel(x_ref, t_ref, out_ref):
        c = pl.program_id(0)
        i = pl.program_id(1)

        @pl.when(i == 0)
        def _init():
            out_ref[...] = jnp.zeros_like(out_ref)

        d = x_ref[...].astype(jnp.float32) - t_ref[...].astype(jnp.float32)

        # Mask the *difference* for rows past the array end: covers garbage
        # from the ragged edge tile's OOB read and the duplicated ceil-chunk
        # step (clamped in in_map).  Zero-padded tail elements already give
        # d == 0, so they need no masking.
        step = c * tpc + i
        row_ids = step * tr + jax.lax.broadcasted_iota(jnp.int32, (tr, _LANES), 0)
        d = jnp.where(row_ids < arr_rows, d, 0.0)

        sq = d * d
        # Fold onto the resident (1, 32, 128) output block: 4 independent
        # (8,128) accumulation chains keep the loop-carried VALU add latency
        # off the critical path; collapse to a scalar happens once, outside.
        out_ref[...] += jnp.sum(sq.reshape(-1, _ACC_ROWS, _LANES), axis=0)[None]

    partials = pl.pallas_call(
        kernel,
        out_shape=jax.ShapeDtypeStruct((num_chunks, _ACC_ROWS, _LANES), jnp.float32),
        grid_spec=pltpu.PrefetchScalarGridSpec(
            num_scalar_prefetch=0,
            grid=(num_chunks, tpc),
            in_specs=[
                pl.BlockSpec((tr, _LANES), in_map),
                pl.BlockSpec((tr, _LANES), in_map),
            ],
            out_specs=pl.BlockSpec((1, _ACC_ROWS, _LANES), lambda c, i: (c, 0, 0)),
        ),
        compiler_params=pltpu.CompilerParams(
            dimension_semantics=("parallel", "arbitrary"),
            vmem_limit_bytes=32 * 1024 * 1024),
        cost_estimate=pl.CostEstimate(
            flops=3 * n_elems,
            transcendentals=0,
            bytes_accessed=2 * padded * itemsize
                           + num_chunks * _ACC_ROWS * _LANES * 4),
    )(x2, t2)

    # ---- O(1) scalar epilogue (matches the PyTorch op order) ----------------
    sse = jnp.sum(partials)
    mse = sse / jnp.float32(n_elems)
    elbo = mse + jnp.asarray(beta, jnp.float32) * jnp.asarray(kl, jnp.float32)
    return elbo * jnp.float32(train_size)


if __name__ == "__main__":
    key = jax.random.PRNGKey(0)
    k1, k2, k3 = jax.random.split(key, 3)

    # Shapes consistent with a typical Bayesian-CNN usage: NCHW predictions.
    N, C, H, W = 2, 4, 16, 16
    train_size = 1000

    x = jax.random.normal(k1, (N, C, H, W), dtype=jnp.float32)
    target = jax.random.normal(k2, (N, C, H, W), dtype=jnp.float32)
    kl = jnp.abs(jax.random.normal(k3, (), dtype=jnp.float32))
    beta = jnp.float32(0.1)

    out = jax.block_until_ready(
        elbo_forward(x, target, kl, beta, train_size, min_kernel_bytes=0))
    ref = _elbo_ref(x, target, kl, beta, train_size)
    assert jnp.allclose(out, ref, rtol=1e-5, atol=1e-5), (out, ref)

    k4, k5, k6, k7, k8, k9 = jax.random.split(k3, 6)

    # Awkward (non-multiple-of-128) element count -> minimal last-row padding.
    xo = jax.random.normal(k4, (3, 4, 15, 17), dtype=jnp.float32)
    to = jax.random.normal(k5, (3, 4, 15, 17), dtype=jnp.float32)
    out2 = jax.block_until_ready(
        elbo_forward(xo, to, kl, beta, train_size, min_kernel_bytes=0))
    ref2 = _elbo_ref(xo, to, kl, beta, train_size)
    assert jnp.allclose(out2, ref2, rtol=1e-5, atol=1e-5), (out2, ref2)

    # bf16 native-dtype streaming (no wrapper upcast).
    xb = jax.random.normal(k6, (4, 8, 32, 32), dtype=jnp.bfloat16)
    tb = jax.random.normal(k7, (4, 8, 32, 32), dtype=jnp.bfloat16)
    out3 = jax.block_until_ready(
        elbo_forward(xb, tb, kl, beta, train_size, min_kernel_bytes=0))
    ref3 = _elbo_ref(xb, tb, kl, beta, train_size)
    assert jnp.allclose(out3, ref3, rtol=1e-4, atol=1e-4), (out3, ref3)

    # Odd tile count -> 2-way chunk split with a clamped, fully-masked extra
    # step, plus a ragged (masked) edge tile; no wrapper-side padding at all.
    xl = jax.random.normal(k8, (5, 8, 64, 64), dtype=jnp.float32)
    tl = jax.random.normal(k9, (5, 8, 64, 64), dtype=jnp.float32)
    out4 = jax.block_until_ready(
        elbo_forward(xl, tl, kl, beta, train_size,
                     tile_rows=512, min_kernel_bytes=0))
    ref4 = _elbo_ref(xl, tl, kl, beta, train_size)
    assert jnp.allclose(out4, ref4, rtol=1e-4, atol=1e-3), (out4, ref4)

    # Tiny-input fallback path (plain jnp, no kernel launch).
    out5 = jax.block_until_ready(elbo_forward(x, target, kl, beta, train_size))
    assert jnp.allclose(out5, ref, rtol=1e-5, atol=1e-5), (out5, ref)

    print("KERNEL_OK")
</pallas_src>

<mosaic_0001>
module attributes {stable_mosaic.version = 11 : i64} {
  func.func @kernel(%arg0: i32, %arg1: i32, %arg2: memref<32x128xf32, #tpu.memory_space<vmem>>, %arg3: memref<32x128xf32, #tpu.memory_space<vmem>>, %arg4: memref<1x32x128xf32, #tpu.memory_space<vmem>>) attributes {dimension_semantics = [#tpu.dimension_semantics<parallel>, #tpu.dimension_semantics<arbitrary>], iteration_bounds = array<i64: 1, 1>, scalar_prefetch = 0 : i64, scratch_operands = 0 : i64, tpu.core_type = #tpu.core_type<tc>, window_params = [{transform_indices = @transform_0, window_bounds = array<i64: 32, 128>}, {transform_indices = @transform_1, window_bounds = array<i64: 32, 128>}, {transform_indices = @transform_2, window_bounds = array<i64: 1, 32, 128>}]} {
    %c0_i32 = arith.constant 0 : i32
    %0 = arith.cmpi eq, %arg1, %c0_i32 : i32
    %1 = arith.extui %0 : i1 to i32
    %c0_i32_0 = arith.constant 0 : i32
    %2 = arith.cmpi ne, %1, %c0_i32_0 : i32
    scf.if %2 {
      %cst_12 = arith.constant 0.000000e+00 : f32
      %23 = vector.broadcast %cst_12 : f32 to vector<1x32x128xf32>
      %c0_13 = arith.constant 0 : index
      %c0_14 = arith.constant 0 : index
      %c0_15 = arith.constant 0 : index
      %24 = vector.load %arg4[%c0_13, %c0_14, %c0_15] : memref<1x32x128xf32, #tpu.memory_space<vmem>>, vector<1x32x128xf32>
      tpu.vector_store %arg4[%c0_13, %c0_14, %c0_15], %23 {strides = array<i32>} : memref<1x32x128xf32, #tpu.memory_space<vmem>>, vector<1x32x128xf32>,
    } else {
    }
    %c0 = arith.constant 0 : index
    %c0_1 = arith.constant 0 : index
    %3 = vector.load %arg2[%c0, %c0_1] : memref<32x128xf32, #tpu.memory_space<vmem>>, vector<32x128xf32>
    %c0_2 = arith.constant 0 : index
    %c0_3 = arith.constant 0 : index
    %4 = vector.load %arg3[%c0_2, %c0_3] : memref<32x128xf32, #tpu.memory_space<vmem>>, vector<32x128xf32>
    %5 = arith.subf %3, %4 : vector<32x128xf32>
    %c1_i32 = arith.constant 1 : i32
    %6 = arith.muli %arg0, %c1_i32 : i32
    %7 = arith.addi %6, %arg1 : i32
    %c32_i32 = arith.constant 32 : i32
    %8 = arith.muli %7, %c32_i32 : i32
    %9 = tpu.iota {dimensions = array<i32: 0>} : vector<32x128xi32>
    %10 = vector.broadcast %8 : i32 to vector<32x128xi32>
    %11 = arith.addi %10, %9 : vector<32x128xi32>
    %c32_i32_4 = arith.constant 32 : i32
    %12 = vector.broadcast %c32_i32_4 : i32 to vector<32x128xi32>
    %13 = arith.cmpi slt, %11, %12 : vector<32x128xi32>
    %cst = arith.constant 0.000000e+00 : f32
    %14 = vector.broadcast %cst : f32 to vector<32x128xf32>
    %15 = arith.select %13, %5, %14 : vector<32x128xi1>, vector<32x128xf32>
    %16 = arith.mulf %15, %15 : vector<32x128xf32>
    %c0_5 = arith.constant 0 : index
    %c0_6 = arith.constant 0 : index
    %c0_7 = arith.constant 0 : index
    %17 = vector.load %arg4[%c0_5, %c0_6, %c0_7] : memref<1x32x128xf32, #tpu.memory_space<vmem>>, vector<1x32x128xf32>
    %18 = vector.shape_cast %16 : vector<32x128xf32> to vector<1x32x128xf32>
    %cst_8 = arith.constant dense<0.000000e+00> : vector<32x128xf32>
    %19 = vector.multi_reduction <add>, %18, %cst_8 [0] : vector<1x32x128xf32> to vector<32x128xf32>
    %20 = vector.shape_cast %19 : vector<32x128xf32> to vector<1x32x128xf32>
    %21 = arith.addf %17, %20 : vector<1x32x128xf32>
    %c0_9 = arith.constant 0 : index
    %c0_10 = arith.constant 0 : index
    %c0_11 = arith.constant 0 : index
    %22 = vector.load %arg4[%c0_9, %c0_10, %c0_11] : memref<1x32x128xf32, #tpu.memory_space<vmem>>, vector<1x32x128xf32>
    tpu.vector_store %arg4[%c0_9, %c0_10, %c0_11], %21 {strides = array<i32>} : memref<1x32x128xf32, #tpu.memory_space<vmem>>, vector<1x32x128xf32>,
    return
  }
  func.func @transform_0(%arg0: i32, %arg1: i32) -> (i32, i32) {
    %c1_i32 = arith.constant 1 : i32
    %0 = arith.muli %arg0, %c1_i32 : i32
    %1 = arith.addi %0, %arg1 : i32
    %c0_i32 = arith.constant 0 : i32
    %2 = arith.minsi %1, %c0_i32 : i32
    %c0_i32_0 = arith.constant 0 : i32
    %c0_i32_1 = arith.constant 0 : i32
    return %2, %c0_i32_0 : i32, i32
  }
  func.func @transform_1(%arg0: i32, %arg1: i32) -> (i32, i32) {
    %c1_i32 = arith.constant 1 : i32
    %0 = arith.muli %arg0, %c1_i32 : i32
    %1 = arith.addi %0, %arg1 : i32
    %c0_i32 = arith.constant 0 : i32
    %2 = arith.minsi %1, %c0_i32 : i32
    %c0_i32_0 = arith.constant 0 : i32
    %c0_i32_1 = arith.constant 0 : i32
    return %2, %c0_i32_0 : i32, i32
  }
  func.func @transform_2(%arg0: i32, %arg1: i32) -> (i32, i32, i32) {
    %c0_i32 = arith.constant 0 : i32
    %c0_i32_0 = arith.constant 0 : i32
    %c0_i32_1 = arith.constant 0 : i32
    return %arg0, %c0_i32, %c0_i32_0 : i32, i32, i32
  }
}

</mosaic_0001>

<bundles_post_ra>
// kernel: tpu_custom_call.1
= control target key start
LH: loop header
LB: loop body
LE: loop exit
PB: predicated region body
PF: predicated region fallthrough
CT: control target
= control target key end

     0   :  { %7 = vsyncpa [#allocation3], 0  ;;  %s285_s0 = inlined_call_operand.hbm [shape: f32[32,128], index: 0, kind: input, shape index: {}]   ;;  %s286_s1 = inlined_call_operand.hbm [shape: f32[32,128], index: 1, kind: input, shape index: {}]   ;;  %s287_s2 = inlined_call_operand.hbm [shape: f32[1,32,128], index: 2, kind: output, shape index: {}]  }
   0x1   :  { %8 = vsyncpa [#allocation6], 0 }
   0x2   :  { %9 = vsyncpa [#allocation4], 0  ;;  %s220_s9 = smov [#allocation2]   ;;  %s148_s13 = scalar_lea.hbm %s285_s0, 512 }
   0x3   :  { %s21_s10 = sshll.u32 %s220_s9, 4  ;;  %p149_p0 = scmp.ne.s32.totalorder %s285_s0, %s148_s13  ;;  %s22_s10 = int_to_ptr.vmem [resolvable:$true] %s21_s10 }
   0x4   :  { %p152_p1 = scmp.lt.u32.totalorder %s148_s13, %s285_s0 }
   0x6   :  { %p154_p2 = pnand %p152_p1, %p149_p0 }
   0x8   :  { %157 = shalt.err (!%p154_p2)
}
   0x9   :  { %s158_s18 = scalar_lea.vmem %s22_s10, 512  ;;  %p163_p4 = scmp.lt.s32.totalorder %s22_s10, %s22_s10 }
   0xa   :  { %p159_p3 = scmp.ne.s32.totalorder %s22_s10, %s158_s18  ;;  %p164_p5 = scmp.lt.s32.totalorder %s158_s18, %s158_s18 }
   0xc   :  { %p165_p6 = por %p164_p5, %p163_p4 }
   0xe   :  { %p166_p7 = pnand %p165_p6, %p159_p3 }
  0x10   :  { %169 = shalt.err (!%p166_p7)
}
  0x11   :  { %s221_s19 = smov 128   ;;  %s222_s20 = smov 8  }
  0x12   :  { %27 = dma.hbm_to_vmem [thread:$0]  %s285_s0, 512, %s22_s10, [#allocation3], %s221_s19, %s221_s19, %s222_s20  }
  0x13   :  { %s223_s23 = smov [#allocation5]   ;;  %s170_s27 = scalar_lea.hbm %s286_s1, 512 }
  0x14   :  { %s39_s24 = sshll.u32 %s223_s23, 4  ;;  %p171_p8 = scmp.ne.s32.totalorder %s286_s1, %s170_s27  ;;  %s40_s24 = int_to_ptr.vmem [resolvable:$true] %s39_s24 }
  0x15   :  { %p174_p9 = scmp.lt.u32.totalorder %s170_s27, %s286_s1 }
  0x17   :  { %p176_p10 = pnand %p174_p9, %p171_p8 }
  0x19   :  { %179 = shalt.err (!%p176_p10)
}
  0x1a   :  { %s180_s4 = scalar_lea.vmem %s40_s24, 512  ;;  %p185_p12 = scmp.lt.s32.totalorder %s40_s24, %s40_s24 }
  0x1b   :  { %p181_p11 = scmp.ne.s32.totalorder %s40_s24, %s180_s4  ;;  %p186_p13 = scmp.lt.s32.totalorder %s180_s4, %s180_s4 }
  0x1d   :  { %p187_p0 = por %p186_p13, %p185_p12 }
  0x1f   :  { %p188_p1 = pnand %p187_p0, %p181_p11 }
  0x21   :  { %191 = shalt.err (!%p188_p1)
}
  0x22   :  { %45 = dma.hbm_to_vmem [thread:$0]  %s286_s1, 512, %s40_s24, [#allocation6], %s221_s19, %s221_s19, %s222_s20  }
  0x23   :  { %214 = dma.done.wait [#allocation3], 512  }
  0x24   :  { %215 = vsyncadd [#allocation3], 4294966784 }
  0x25   :  { %216 = dma.done.wait [#allocation6], 512  }
  0x26   :  { %217 = vsyncadd [#allocation6], 4294966784  ;;  %v68_v0 = vld [vmem:[#allocation2] sm:$0xff]  ;;  %v69_v2 = vld [vmem:[#allocation2 + $0x8] sm:$0xff]  ;;  %s224_s1 = smov [#allocation7]  }
  0x27   :  { %v72_v1 = vld [vmem:[#allocation5] sm:$0xff]  ;;  %v73_v4 = vld [vmem:[#allocation5 + $0x8] sm:$0xff]  ;;  %v70_v5 = vld [vmem:[#allocation2 + $0x10] sm:$0xff]  ;;  %s125_s6 = sshll.u32 %s224_s1, 4  ;;  %s126_s6 = int_to_ptr.vmem [resolvable:$true] %s125_s6 }
  0x28   :  { %v76_v3 = vsub.f32 %v68_v0, %v72_v1  ;;  %v74_v6 = vld [vmem:[#allocation5 + $0x10] sm:$0xff]  ;;  %v77_v7 = vsub.f32 %v69_v2, %v73_v4  ;;  %v71_v9 = vld [vmem:[#allocation2 + $0x18] sm:$0xff]  ;;  %s192_s7 = scalar_lea.vmem %s126_s6, 512  ;;  %p197_p3 = scmp.lt.s32.totalorder %s126_s6, %s126_s6 }
  0x29   :  { %v78_v8 = vsub.f32 %v70_v5, %v74_v6  ;;  %v75_v10 = vld [vmem:[#allocation5 + $0x18] sm:$0xff]  ;;  %p193_p2 = scmp.ne.s32.totalorder %s126_s6, %s192_s7  ;;  %p198_p4 = scmp.lt.s32.totalorder %s192_s7, %s192_s7 }
  0x2a   :  { %v100_v11 = vmul.f32 %v76_v3, %v76_v3  ;;  %v79_v12 = vsub.f32 %v71_v9, %v75_v10  ;;  %v101_v13 = vmul.f32 %v77_v7, %v77_v7 }
  0x2b   :  { %v102_v14 = vmul.f32 %v78_v8, %v78_v8  ;;  %p199_p5 = por %p198_p4, %p197_p3 }
  0x2c   :  { %v103_v15 = vmul.f32 %v79_v12, %v79_v12  ;;  %116 = vst [vmem:[#allocation7] sm:$0xff] %v100_v11  ;;  %117 = vst [vmem:[#allocation7 + $0x8] sm:$0xff] %v101_v13 }
  0x2d   :  { %118 = vst [vmem:[#allocation7 + $0x10] sm:$0xff] %v102_v14  ;;  %p200_p6 = pnand %p199_p5, %p193_p2 }
  0x2e   :  { %119 = vst [vmem:[#allocation7 + $0x18] sm:$0xff] %v103_v15 }
  0x2f   :  { %203 = shalt.err (!%p200_p6)
}
  0x30   :  { %s204_s10 = scalar_lea.hbm %s287_s2, 512 }
  0x31   :  { %p205_p7 = scmp.ne.s32.totalorder %s287_s2, %s204_s10  ;;  %p208_p8 = scmp.lt.u32.totalorder %s204_s10, %s287_s2 }
  0x33   :  { %p210_p9 = pnand %p208_p8, %p205_p7 }
  0x35   :  { %213 = shalt.err (!%p210_p9)
}
  0x36   :  { %131 = dma.vmem_to_hbm [thread:$0]  %s126_s6, 512, %s287_s2, [#allocation4], %s221_s19, %s221_s19, %s222_s20  }
  0x37   :  { %218 = dma.done.wait [#allocation4], 512  }
  0x38   :  { %219 = vsyncadd [#allocation4], 4294966784 }
  0x39   :  { %135 = vsyncpa [#allocation3], 1 }
  0x3a   :  { %136 = vsyncpa [#allocation6], 1 }
  0x3b   :  { %137 = vsyncpa [#allocation4], 1 }

</bundles_post_ra>
